<compile_context>
chip_gen: v6e
topology: v6e:2x2x1
jax: 0.10.0
libtpu: 0.0.40
codegen_flags: <defaults>
</compile_context>

<pallas_src>
import math
import numpy as np
import jax
import jax.numpy as jnp
from jax.experimental import pallas as pl
from jax.experimental.pallas import tpu as pltpu


LANE = 128           # classifier outputs padded to a lane-dense width
SENT_PAD = LANE      # lane-dense sentence-pooling output width


def _round_up(x, m):
    return ((x + m - 1) // m) * m


def _device_flags():
    try:
        kind = jax.devices()[0].device_kind.lower()
    except Exception:
        kind = ""
    is_v7 = ("v7" in kind) or ("7x" in kind)
    is_v6 = "v6" in kind
    return is_v6, is_v7


# --------------------------------------------------------------------------
# Kernel 1: fused localized-context pooling + context vectors + evidence pooling,
# batched over documents.
#   ht_att = normalize(mean_heads(h_att * t_att))
#   rs     = ht_att @ seq
#   s_attn = ht_att @ sent_mask          (sentence evidence pooling, fused)
# --------------------------------------------------------------------------

def _ht_rs_kernel(h_ref, t_ref, seq_ref, mask_ref, rs_ref, sattn_ref):
    # h_ref/t_ref: (nH, Tp, L) bf16 ; seq_ref: (L, H) bf16 ; mask_ref: (L, S) bf16
    nH = h_ref.shape[0]
    acc = h_ref[0].astype(jnp.float32) * t_ref[0].astype(jnp.float32)
    for hh in range(1, nH):                       # static unroll over heads (small)
        acc = acc + h_ref[hh].astype(jnp.float32) * t_ref[hh].astype(jnp.float32)
    m = acc * (1.0 / nH)                          # mean over heads
    denom = jnp.sum(m, axis=-1, keepdims=True) + 1e-30
    att = m / denom                               # exact divide (feeds logits + KL loss)
    att_bf = att.astype(jnp.bfloat16)
    rs_ref[...] = jnp.dot(att_bf, seq_ref[...], preferred_element_type=jnp.float32)
    sattn_ref[...] = jnp.dot(att_bf, mask_ref[...], preferred_element_type=jnp.float32)


def pallas_ht_rs_evi(h_b, t_b, seq_bf16, mask_b, pair_tile, vmem_limit):
    """h_b/t_b: (B, nH, Pp, L) bf16, seq: (B, L, H) bf16, mask: (B, L, S) bf16
       -> rs (B, Pp, H) f32, s_attn (B, Pp, S) f32."""
    B, nH, Pp, L = h_b.shape
    H = seq_bf16.shape[-1]
    S = mask_b.shape[-1]
    return pl.pallas_call(
        _ht_rs_kernel,
        out_shape=(jax.ShapeDtypeStruct((B, Pp, H), jnp.float32),
                   jax.ShapeDtypeStruct((B, Pp, S), jnp.float32)),
        grid=(B, Pp // pair_tile),
        in_specs=[
            pl.BlockSpec((None, nH, pair_tile, L), lambda b, p: (b, 0, p, 0)),
            pl.BlockSpec((None, nH, pair_tile, L), lambda b, p: (b, 0, p, 0)),
            pl.BlockSpec((None, L, H), lambda b, p: (b, 0, 0)),
            pl.BlockSpec((None, L, S), lambda b, p: (b, 0, 0)),
        ],
        out_specs=(pl.BlockSpec((None, pair_tile, H), lambda b, p: (b, p, 0)),
                   pl.BlockSpec((None, pair_tile, S), lambda b, p: (b, p, 0))),
        compiler_params=pltpu.CompilerParams(
            dimension_semantics=("parallel", "parallel"),
            vmem_limit_bytes=vmem_limit),
    )(h_b, t_b, seq_bf16, mask_b)


# --------------------------------------------------------------------------
# Kernel 2: fused RE head — split [x|rs] extractors + tanh + grouped bilinear + classifier.
#
# Features are column-permuted (k' = i*G + g, G = E // Bk) so the within-group index
# shift of the grouped bilinear becomes a circular shift of the whole E lane axis,
# realised as Bk static lane slices of a doubled VMEM copy of zt.  All Bk shifted bf16
# products are packed into one (tile, Bk*E) scratch and hit the MXU in a SINGLE matmul
# against the pre-flattened (Bk*E, Rp) weight; bias folds into the single output store.
# --------------------------------------------------------------------------

def _rel_kernel(hs_ref, ts_ref, rs_ref, whx_ref, whr_ref, bh_ref,
                wtx_ref, wtr_ref, bt_ref, wd_ref, bbl_ref,
                o_ref, zt2_ref, prod_ref):
    E = whx_ref.shape[1]
    KE = prod_ref.shape[1]
    Bk = KE // E
    G = E // Bk
    rsb = rs_ref[...]
    # bf16 MXU operands, f32 accumulation; tanh epilogue stays f32.
    zh = jnp.tanh(jnp.dot(hs_ref[...], whx_ref[...], preferred_element_type=jnp.float32)
                  + jnp.dot(rsb, whr_ref[...], preferred_element_type=jnp.float32)
                  + bh_ref[...])
    zt = jnp.tanh(jnp.dot(ts_ref[...], wtx_ref[...], preferred_element_type=jnp.float32)
                  + jnp.dot(rsb, wtr_ref[...], preferred_element_type=jnp.float32)
                  + bt_ref[...])
    zt2_ref[:, 0:E] = zt                 # doubled copy: circular shifts == static slices
    zt2_ref[:, E:2 * E] = zt
    for d in range(Bk):                  # static unroll (Bk is small)
        ztd = zt2_ref[:, d * G:d * G + E]            # roll(zt, -d*G) in permuted layout
        prod_ref[:, d * E:(d + 1) * E] = (zh * ztd).astype(jnp.bfloat16)
    # single deep (K = Bk*E) matmul + bias, single output store
    o_ref[...] = (jnp.dot(prod_ref[...], wd_ref[...], preferred_element_type=jnp.float32)
                  + bbl_ref[...])


def pallas_rel_head(hs, ts, rs, whx, whr, bh, wtx, wtr, bt, wd, bbl,
                    num_rels, pair_tile, vmem_limit):
    """hs/ts/rs: (P, H) bf16. Returns (P, num_rels) f32 logits."""
    P, H = hs.shape
    E = whx.shape[1]
    KE, Rp = wd.shape
    tile = min(pair_tile, _round_up(P, 16))
    Pp = _round_up(P, tile)
    if Pp != P:
        pad = ((0, Pp - P), (0, 0))
        hs = jnp.pad(hs, pad); ts = jnp.pad(ts, pad); rs = jnp.pad(rs, pad)
    full2 = lambda i: (0, 0)
    out = pl.pallas_call(
        _rel_kernel,
        out_shape=jax.ShapeDtypeStruct((Pp, Rp), jnp.float32),
        grid=(Pp // tile,),
        in_specs=[
            pl.BlockSpec((tile, H), lambda i: (i, 0)),
            pl.BlockSpec((tile, H), lambda i: (i, 0)),
            pl.BlockSpec((tile, H), lambda i: (i, 0)),
            pl.BlockSpec((H, E), full2),
            pl.BlockSpec((H, E), full2),
            pl.BlockSpec((1, E), full2),
            pl.BlockSpec((H, E), full2),
            pl.BlockSpec((H, E), full2),
            pl.BlockSpec((1, E), full2),
            pl.BlockSpec((KE, Rp), full2),
            pl.BlockSpec((1, Rp), full2),
        ],
        out_specs=pl.BlockSpec((tile, Rp), lambda i: (i, 0)),
        scratch_shapes=[pltpu.VMEM((tile, 2 * E), jnp.float32),
                        pltpu.VMEM((tile, KE), jnp.bfloat16)],
        compiler_params=pltpu.CompilerParams(
            dimension_semantics=("parallel",),
            vmem_limit_bytes=vmem_limit),
    )(hs, ts, rs, whx, whr, bh, wtx, wtr, bt, wd, bbl)
    return out[:P, :num_rels]


# --------------------------------------------------------------------------
# Host-side weight transforms for the permuted grouped bilinear.
# --------------------------------------------------------------------------

def _grouped_permutation(emb_size, block_size):
    """perm s.t. x[:, perm][:, i*G+g] == x[:, g*Bk+i]."""
    G = emb_size // block_size
    perm = np.empty(emb_size, np.int64)
    for g in range(G):
        for i in range(block_size):
            perm[i * G + g] = g * block_size + i
    return perm


def build_shifted_bilinear(wbl, emb_size, block_size, out_pad):
    """wbl: (E*Bk, R) -> wd: (Bk, E, out_pad) with
       sum_d (zh' * shift_d(zt')) @ wd[d] == bl @ wbl (columns beyond R are zero)."""
    wbl = np.asarray(wbl)
    G = emb_size // block_size
    R = wbl.shape[1]
    wd = np.zeros((block_size, emb_size, out_pad), np.float32)
    for d in range(block_size):
        for g in range(G):
            for i in range(block_size):
                j = (i + d) % block_size
                wd[d, i * G + g, :R] = wbl[g * block_size * block_size + i * block_size + j, :]
    return wd


# --------------------------------------------------------------------------
# Reference / label helpers.
# --------------------------------------------------------------------------

def atloss_get_label(logits, num_labels=-1):
    # Reconstruction of DREEAM ATLoss.get_label (ATLoss class is external to the module source).
    th = logits[:, :1]
    mask = logits > th
    if num_labels > 0:
        top_v = jax.lax.top_k(logits, num_labels)[0][:, -1:]
        mask = jnp.logical_and(mask, logits >= top_v)
    out = jnp.where(mask, 1.0, 0.0).astype(logits.dtype)
    out = out.at[:, 0].set((jnp.sum(out, axis=1) == 0).astype(logits.dtype))
    return out


def rel_reference_numpy(hs, ts, rs, wh, bh, wt, bt, wbl, bbl, E, Bk):
    """NumPy re-implementation of the PyTorch forward_rel (original formulation)."""
    hs, ts, rs, wh, bh, wt, bt, wbl, bbl = map(np.asarray, (hs, ts, rs, wh, bh, wt, bt, wbl, bbl))
    zh = np.tanh(np.concatenate([hs, rs], -1) @ wh + bh)
    zt = np.tanh(np.concatenate([ts, rs], -1) @ wt + bt)
    b1 = zh.reshape(-1, E // Bk, Bk)
    b2 = zt.reshape(-1, E // Bk, Bk)
    bl = (b1[:, :, :, None] * b2[:, :, None, :]).reshape(-1, E * Bk)
    return bl @ wbl + bbl


# --------------------------------------------------------------------------
# Model.
# --------------------------------------------------------------------------

class DocREModelPallas:
    def __init__(self, hidden_size, num_rel_labels, key, num_attn_heads=8,
                 vocab_size=100, emb_size=128, block_size=16, num_labels=-1,
                 max_sent_num=6, evi_thresh=0.2, transformer_type='bert'):
        self.hidden_size = hidden_size
        self.total_labels = num_rel_labels
        self.num_attn_heads = num_attn_heads
        self.emb_size = emb_size
        self.block_size = block_size
        self.num_labels = num_labels
        self.max_sent_num = max_sent_num
        self.evi_thresh = evi_thresh
        self.transformer_type = transformer_type

        is_v6, is_v7 = _device_flags()
        self._is_v7 = is_v7
        # RE-head tile: weights are resident, taller M amortizes per-step overhead.
        self.rel_tile = 512 if (is_v6 or is_v7) else 128
        # Mosaic needs headroom below physical VMEM (64 MiB on v7x, 128 MiB otherwise).
        self._vmem_limit = (48 << 20) if is_v7 else (96 << 20)
        # VMEM budget for kernel-1's two double-buffered bf16 attention inputs.
        self._k1_budget = (24 << 20) if is_v7 else (48 << 20)

        ks = jax.random.split(key, 16)
        H2 = hidden_size * 2

        def w(k, shape, scale=0.02):
            return jax.random.normal(k, shape, jnp.float32) * scale

        # original-layout f32 parameters (kept for the numerical reference)
        self.head_w = w(ks[0], (H2, emb_size)); self.head_b = w(ks[1], (1, emb_size))
        self.tail_w = w(ks[2], (H2, emb_size)); self.tail_b = w(ks[3], (1, emb_size))
        self.bil_w = w(ks[4], (emb_size * block_size, num_rel_labels))
        self.bil_b = w(ks[5], (1, num_rel_labels))
        self.p_head_w = w(ks[6], (H2, emb_size)); self.p_head_b = w(ks[7], (1, emb_size))
        self.p_tail_w = w(ks[8], (H2, emb_size)); self.p_tail_b = w(ks[9], (1, emb_size))
        self.p_bil_w = w(ks[10], (emb_size * block_size, num_rel_labels))
        self.p_bil_b = w(ks[11], (1, num_rel_labels))

        # kernel-ready versions: permuted feature layout, projection split into
        # hs/rs halves (no host concat), bf16 MXU operands, flattened shifted bilinear,
        # classifier padded to a lane-dense 128-wide output.
        perm = _grouped_permutation(emb_size, block_size)
        Rp = _round_up(num_rel_labels, LANE)
        self.num_rel_pad = Rp
        H = hidden_size

        def prep(wh, bh, wt, bt, wbl, bbl):
            whp = np.asarray(wh)[:, perm]
            wtp = np.asarray(wt)[:, perm]
            wh_x = jnp.asarray(whp[:H], jnp.bfloat16)
            wh_r = jnp.asarray(whp[H:], jnp.bfloat16)
            wt_x = jnp.asarray(wtp[:H], jnp.bfloat16)
            wt_r = jnp.asarray(wtp[H:], jnp.bfloat16)
            bh_k = jnp.asarray(np.asarray(bh)[:, perm], jnp.float32)
            bt_k = jnp.asarray(np.asarray(bt)[:, perm], jnp.float32)
            wd = build_shifted_bilinear(wbl, emb_size, block_size, Rp)
            wd = jnp.asarray(wd.reshape(emb_size * block_size, Rp), jnp.bfloat16)
            bblp = np.zeros((1, Rp), np.float32)
            bblp[:, :num_rel_labels] = np.asarray(bbl)
            return wh_x, wh_r, bh_k, wt_x, wt_r, bt_k, wd, jnp.asarray(bblp)

        (self.head_wx_k, self.head_wr_k, self.head_b_k,
         self.tail_wx_k, self.tail_wr_k, self.tail_b_k,
         self.bil_wd, self.bil_b_k) = prep(self.head_w, self.head_b, self.tail_w,
                                           self.tail_b, self.bil_w, self.bil_b)
        (self.p_head_wx_k, self.p_head_wr_k, self.p_head_b_k,
         self.p_tail_wx_k, self.p_tail_wr_k, self.p_tail_b_k,
         self.p_bil_wd, self.p_bil_b_k) = prep(self.p_head_w, self.p_head_b,
                                               self.p_tail_w, self.p_tail_b,
                                               self.p_bil_w, self.p_bil_b)

        # TODO(synk): process_long_input over pretrained value/policy LMs is replaced by
        # a small deterministic synthetic encoder (no checkpoint loading possible here).
        def enc_params(k):
            kk = jax.random.split(k, 4)
            return {
                'tok': jax.random.normal(kk[0], (vocab_size, hidden_size), jnp.float32),
                'wo': w(kk[1], (hidden_size, hidden_size)),
                'wq': w(kk[2], (hidden_size, hidden_size), 0.05),
                'wk': w(kk[3], (hidden_size, hidden_size), 0.05),
            }
        self.value_enc = enc_params(ks[12])
        self.policy_enc = enc_params(ks[13])

    # ------------- encoder stand-in (plain JAX; not the spec's hot path) -------------
    def _encoder(self, params, input_ids, attention_mask):
        emb = params['tok'][input_ids]                                   # (B, L, H)
        seq = jnp.tanh(emb @ params['wo'])
        B, L, H = emb.shape
        dh = H // self.num_attn_heads
        q = (emb @ params['wq']).reshape(B, L, self.num_attn_heads, dh).transpose(0, 2, 1, 3)
        k = (emb @ params['wk']).reshape(B, L, self.num_attn_heads, dh).transpose(0, 2, 1, 3)
        scores = jnp.einsum('bhld,bhmd->bhlm', q, k) / math.sqrt(dh)
        bias = (1.0 - attention_mask[:, None, None, :]) * -1e9
        attn = jax.nn.softmax(scores + bias, axis=-1)                    # (B, nH, L, L)
        return seq, attn

    def encode(self, input_ids, attention_mask):
        v_seq, v_attn = self._encoder(self.value_enc, input_ids, attention_mask)
        p_seq, p_attn = self._encoder(self.policy_enc, input_ids, attention_mask)
        return v_seq, v_attn, p_seq, p_attn

    def _kernel1_tile(self, nH, L, Pmax):
        # 2 inputs x 2 pipeline buffers x bf16 bytes per pair row
        per_row = 2 * 2 * 2 * nH * L
        t = max(16, min(512, (self._k1_budget // per_row) // 16 * 16))
        return min(t, _round_up(Pmax, 16))

    # ------------- hrt extraction (mirrors get_hrt; fused kernel also does evidence pooling) -------------
    def get_hrt(self, sequence_output, attention, entity_pos, hts, offset, sent_pos=None):
        B, nH, _, L = attention.shape
        H = sequence_output.shape[-1]
        seq_bf16 = sequence_output.astype(jnp.bfloat16)        # hoisted single cast

        batch_rel = [len(h) for h in hts]
        Pmax = max(batch_rel)
        tile = self._kernel1_tile(nH, L, Pmax)
        Pp = _round_up(Pmax, tile)

        hss, tss, h_docs, t_docs = [], [], [], []
        # TODO(synk): per-entity gather still happens host-side (variable-length mention
        # lists); a scalar-prefetch index-table gather inside the kernel would remove it.
        for i in range(len(entity_pos)):
            embs, atts = [], []
            for e in entity_pos[i]:
                if len(e) > 1:
                    e_emb = [sequence_output[i, s + offset] for (s, _) in e if s + offset < L]
                    e_att = [attention[i, :, s + offset] for (s, _) in e if s + offset < L]
                    if e_emb:
                        emb = jax.nn.logsumexp(jnp.stack(e_emb, 0), axis=0)
                        att = jnp.mean(jnp.stack(e_att, 0), axis=0)
                    else:
                        emb = jnp.zeros((H,), jnp.float32)
                        att = jnp.zeros((nH, L), jnp.float32)
                else:
                    s, _ = e[0]
                    if s + offset < L:
                        emb = sequence_output[i, s + offset]
                        att = attention[i, :, s + offset]
                    else:
                        emb = jnp.zeros((H,), jnp.float32)
                        att = jnp.zeros((nH, L), jnp.float32)
                embs.append(emb)
                atts.append(att)
            entity_embs = jnp.stack(embs, 0)                          # (nE, H)
            entity_atts = jnp.stack(atts, 1).astype(jnp.bfloat16)     # (nH, nE, L) bf16
            ht = np.asarray(hts[i])
            n = batch_rel[i]
            h_idx = np.zeros((Pp,), np.int32); h_idx[:n] = ht[:, 0]
            t_idx = np.zeros((Pp,), np.int32); t_idx[:n] = ht[:, 1]
            h_docs.append(entity_atts[:, jnp.asarray(h_idx), :])      # (nH, Pp, L) bf16
            t_docs.append(entity_atts[:, jnp.asarray(t_idx), :])
            hss.append(entity_embs[ht[:, 0]])
            tss.append(entity_embs[ht[:, 1]])

        h_b = jnp.stack(h_docs, 0)                                    # (B, nH, Pp, L) bf16
        t_b = jnp.stack(t_docs, 0)

        # lane-dense 0/1 sentence masks (exact in bf16); host-side glue like entity_pos.
        masks = np.zeros((B, L, SENT_PAD), np.float32)
        if sent_pos is not None:
            for i, sp in enumerate(sent_pos):
                for si, (s0, s1) in enumerate(sp):
                    masks[i, s0 + offset:s1 + offset, si] = 1.0
        mask_b = jnp.asarray(masks, jnp.bfloat16)

        rs_b, sattn_b = pallas_ht_rs_evi(h_b, t_b, seq_bf16, mask_b, tile, self._vmem_limit)

        hss = jnp.concatenate(hss, 0)
        tss = jnp.concatenate(tss, 0)
        rss = jnp.concatenate([rs_b[i, :batch_rel[i]] for i in range(B)], 0)
        s_attn = jnp.concatenate([sattn_b[i, :batch_rel[i]] for i in range(B)], 0)
        return hss, rss, tss, s_attn, batch_rel

    # ------------- RE heads (fused Pallas kernel) -------------
    def forward_rel(self, hs, ts, rs):
        return pallas_rel_head(hs.astype(jnp.bfloat16), ts.astype(jnp.bfloat16),
                               rs.astype(jnp.bfloat16),
                               self.head_wx_k, self.head_wr_k, self.head_b_k,
                               self.tail_wx_k, self.tail_wr_k, self.tail_b_k,
                               self.bil_wd, self.bil_b_k,
                               self.total_labels, self.rel_tile, self._vmem_limit)

    def forward_policy(self, hs, ts, rs):
        return pallas_rel_head(hs.astype(jnp.bfloat16), ts.astype(jnp.bfloat16),
                               rs.astype(jnp.bfloat16),
                               self.p_head_wx_k, self.p_head_wr_k, self.p_head_b_k,
                               self.p_tail_wx_k, self.p_tail_wr_k, self.p_tail_b_k,
                               self.p_bil_wd, self.p_bil_b_k,
                               self.total_labels, self.rel_tile, self._vmem_limit)

    # ------------- evidence pooling (already computed inside the fused kernel) -------------
    def forward_evi(self, s_attn_full, sent_pos):
        max_sent = max(len(s) for s in sent_pos)
        return s_attn_full[:, :max_sent]

    # ------------- forward -------------
    def forward(self, input_ids, attention_mask, labels=None, entity_pos=None, hts=None,
                sent_pos=None, sent_labels=None, arg_labels=None, tag='train', func='value'):
        com_labels = labels + arg_labels
        com_labels = jnp.where(com_labels > 0, 1.0, 0.0)
        com_labels = com_labels.at[:, 0].set(
            (jnp.sum(com_labels[:, 1:], axis=1) == 0.0).astype(com_labels.dtype))
        offset = 1 if self.transformer_type in ('bert', 'roberta') else 0

        v_seq, v_attn, p_seq, p_attn = self.encode(input_ids, attention_mask)

        if func == 'value':
            hs, rs, ts, s_attn_full, batch_rel = self.get_hrt(
                v_seq, v_attn, entity_pos, hts, offset, sent_pos)
            value_logits = self.forward_rel(hs, ts, rs)
            output = {}
            output['rel_pred'] = atloss_get_label(value_logits, self.num_labels)
            if sent_labels is not None:
                s_attn = self.forward_evi(s_attn_full, sent_pos)
                pad = self.max_sent_num - s_attn.shape[-1]
                output['evi_pred'] = jnp.pad(s_attn > self.evi_thresh, ((0, 0), (0, pad)))
            # TODO(synk): ATLoss (adaptive-threshold RE loss with negative sampling) is
            # defined outside this module's source; 'rel_loss' value is not reproduced.
            output['rel_loss'] = {}
            if sent_labels is not None:
                used = (jnp.sum(com_labels[:, 1:], axis=-1) > 0).astype(jnp.float32)
                n_used = jnp.maximum(jnp.sum(used), 1.0)
                norm_s = sent_labels / (jnp.sum(sent_labels, axis=-1, keepdims=True) + 1e-30)
                norm_s = jnp.where(norm_s == 0, 1e-30, norm_s)
                sa = jnp.where(s_attn == 0, 1e-30, s_attn)
                kl = norm_s * (jnp.log(norm_s) - jnp.log(sa))   # KLDivLoss(log(sa), norm_s)
                output['rel_loss']['evi_loss'] = jnp.sum(kl * used[:, None]) / n_used
            return output

        elif func == 'argument':
            output = {}
            hs, rs, ts, _, _ = self.get_hrt(v_seq, v_attn, entity_pos, hts, offset, sent_pos)
            value_logits = self.forward_rel(hs, ts, rs)
            output['value_rel_pred'] = atloss_get_label(value_logits, self.num_labels)
            phs, prs, pts, _, _ = self.get_hrt(p_seq, p_attn, entity_pos, hts, offset, sent_pos)
            policy_logits = self.forward_policy(phs, pts, prs)
            output['policy_rel_pred'] = atloss_get_label(policy_logits, self.num_labels)
            output['prob'] = jax.nn.sigmoid(policy_logits - policy_logits[:, :1])[:, 1:]
            return output

        else:
            # TODO(synk): func == 'policy' REINFORCE branch (Categorical sampling over
            # sample_times draws + host-side np.random) is not reproduced.
            raise NotImplementedError("policy branch not implemented")


# --------------------------------------------------------------------------
# main
# --------------------------------------------------------------------------

if __name__ == "__main__":
    key = jax.random.PRNGKey(0)
    B, L, H, nH = 2, 128, 128, 8
    E, Bk, R = 128, 16, 8
    VOCAB = 100

    k_ids, k_lab, k_arg, k_sent, k_par, k_chk = jax.random.split(key, 6)

    input_ids = jax.random.randint(k_ids, (B, L), 0, VOCAB)
    attention_mask = jnp.ones((B, L), jnp.float32)

    # entity mention spans per document (start, end); some entities have 2 mentions
    entity_pos = [
        [[(3, 5)], [(10, 12), (40, 42)], [(20, 22)], [(60, 63), (90, 92)]],
        [[(2, 4), (50, 52)], [(15, 17)], [(30, 33)], [(70, 72), (100, 103)]],
    ]
    hts = []
    for ep in entity_pos:
        nE = len(ep)
        hts.append([[a, b] for a in range(nE) for b in range(nE) if a != b])
    P = sum(len(h) for h in hts)  # 24 entity pairs total

    sent_pos = [
        [(0, 40), (40, 80), (80, 120)],
        [(0, 30), (30, 60), (60, 90), (90, 120)],
    ]
    max_sent_batch = max(len(s) for s in sent_pos)

    labels = (jax.random.uniform(k_lab, (P, R)) > 0.8).astype(jnp.float32)
    labels = labels.at[:, 0].set(0.0)
    arg_labels = (jax.random.uniform(k_arg, (P, R)) > 0.8).astype(jnp.float32)
    arg_labels = arg_labels.at[:, 0].set(0.0)
    sent_labels = (jax.random.uniform(k_sent, (P, max_sent_batch)) > 0.5).astype(jnp.float32)

    model = DocREModelPallas(hidden_size=H, num_rel_labels=R, key=k_par,
                             num_attn_heads=nH, vocab_size=VOCAB, emb_size=E,
                             block_size=Bk, num_labels=-1, max_sent_num=6,
                             evi_thresh=0.2, transformer_type='bert')

    out_value = model.forward(input_ids, attention_mask, labels=labels,
                              entity_pos=entity_pos, hts=hts, sent_pos=sent_pos,
                              sent_labels=sent_labels, arg_labels=arg_labels,
                              tag='train', func='value')
    out_arg = model.forward(input_ids, attention_mask, labels=labels,
                            entity_pos=entity_pos, hts=hts, sent_pos=sent_pos,
                            sent_labels=sent_labels, arg_labels=arg_labels,
                            tag='train', func='argument')
    jax.block_until_ready((out_value, out_arg))

    # cross-check the fused Pallas RE head (permuted-layout, flattened shifted-weight,
    # single-matmul bf16 formulation) against a NumPy f32 reference of the original
    # PyTorch grouped bilinear; tolerance sized for bf16 operands with f32 accumulation.
    ck = jax.random.split(k_chk, 3)
    hs_c = jax.random.normal(ck[0], (P, H), jnp.float32)
    ts_c = jax.random.normal(ck[1], (P, H), jnp.float32)
    rs_c = jax.random.normal(ck[2], (P, H), jnp.float32)
    pal = np.asarray(model.forward_rel(hs_c, ts_c, rs_c))
    ref = rel_reference_numpy(hs_c, ts_c, rs_c, model.head_w, model.head_b,
                              model.tail_w, model.tail_b, model.bil_w, model.bil_b, E, Bk)
    assert pal.shape == ref.shape
    assert np.max(np.abs(pal - ref)) < 2e-2, "Pallas rel head mismatch vs reference"

    print("KERNEL_OK")
</pallas_src>

<mosaic_0001>
module attributes {stable_mosaic.version = 11 : i64} {
  func.func @_ht_rs_kernel(%arg0: i32, %arg1: i32, %arg2: memref<1x8x16x128xbf16, #tpu.memory_space<vmem>>, %arg3: memref<1x8x16x128xbf16, #tpu.memory_space<vmem>>, %arg4: memref<1x128x128xbf16, #tpu.memory_space<vmem>>, %arg5: memref<1x128x128xbf16, #tpu.memory_space<vmem>>, %arg6: memref<1x16x128xf32, #tpu.memory_space<vmem>>, %arg7: memref<1x16x128xf32, #tpu.memory_space<vmem>>) attributes {dimension_semantics = [#tpu.dimension_semantics<parallel>, #tpu.dimension_semantics<parallel>], iteration_bounds = array<i64: 2, 1>, scalar_prefetch = 0 : i64, scratch_operands = 0 : i64, tpu.core_type = #tpu.core_type<tc>, window_params = [{transform_indices = @transform_0, window_bounds = array<i64: 1, 8, 16, 128>}, {transform_indices = @transform_1, window_bounds = array<i64: 1, 8, 16, 128>}, {transform_indices = @transform_2, window_bounds = array<i64: 1, 128, 128>}, {transform_indices = @transform_3, window_bounds = array<i64: 1, 128, 128>}, {transform_indices = @transform_4, window_bounds = array<i64: 1, 16, 128>}, {transform_indices = @transform_5, window_bounds = array<i64: 1, 16, 128>}]} {
    %c0 = arith.constant 0 : index
    %c0_0 = arith.constant 0 : index
    %c0_1 = arith.constant 0 : index
    %c0_2 = arith.constant 0 : index
    %0 = vector.load %arg2[%c0, %c0_0, %c0_1, %c0_2] : memref<1x8x16x128xbf16, #tpu.memory_space<vmem>>, vector<1x1x16x128xbf16>
    %1 = vector.shape_cast %0 : vector<1x1x16x128xbf16> to vector<16x128xbf16>
    %2 = arith.extf %1 : vector<16x128xbf16> to vector<16x128xf32>
    %c0_3 = arith.constant 0 : index
    %c0_4 = arith.constant 0 : index
    %c0_5 = arith.constant 0 : index
    %c0_6 = arith.constant 0 : index
    %3 = vector.load %arg3[%c0_3, %c0_4, %c0_5, %c0_6] : memref<1x8x16x128xbf16, #tpu.memory_space<vmem>>, vector<1x1x16x128xbf16>
    %4 = vector.shape_cast %3 : vector<1x1x16x128xbf16> to vector<16x128xbf16>
    %5 = arith.extf %4 : vector<16x128xbf16> to vector<16x128xf32>
    %6 = arith.mulf %2, %5 : vector<16x128xf32>
    %c0_7 = arith.constant 0 : index
    %c1 = arith.constant 1 : index
    %c0_8 = arith.constant 0 : index
    %c0_9 = arith.constant 0 : index
    %7 = vector.load %arg2[%c0_7, %c1, %c0_8, %c0_9] : memref<1x8x16x128xbf16, #tpu.memory_space<vmem>>, vector<1x1x16x128xbf16>
    %8 = vector.shape_cast %7 : vector<1x1x16x128xbf16> to vector<16x128xbf16>
    %9 = arith.extf %8 : vector<16x128xbf16> to vector<16x128xf32>
    %c0_10 = arith.constant 0 : index
    %c1_11 = arith.constant 1 : index
    %c0_12 = arith.constant 0 : index
    %c0_13 = arith.constant 0 : index
    %10 = vector.load %arg3[%c0_10, %c1_11, %c0_12, %c0_13] : memref<1x8x16x128xbf16, #tpu.memory_space<vmem>>, vector<1x1x16x128xbf16>
    %11 = vector.shape_cast %10 : vector<1x1x16x128xbf16> to vector<16x128xbf16>
    %12 = arith.extf %11 : vector<16x128xbf16> to vector<16x128xf32>
    %13 = arith.mulf %9, %12 : vector<16x128xf32>
    %14 = arith.addf %6, %13 : vector<16x128xf32>
    %c0_14 = arith.constant 0 : index
    %c2 = arith.constant 2 : index
    %c0_15 = arith.constant 0 : index
    %c0_16 = arith.constant 0 : index
    %15 = vector.load %arg2[%c0_14, %c2, %c0_15, %c0_16] : memref<1x8x16x128xbf16, #tpu.memory_space<vmem>>, vector<1x1x16x128xbf16>
    %16 = vector.shape_cast %15 : vector<1x1x16x128xbf16> to vector<16x128xbf16>
    %17 = arith.extf %16 : vector<16x128xbf16> to vector<16x128xf32>
    %c0_17 = arith.constant 0 : index
    %c2_18 = arith.constant 2 : index
    %c0_19 = arith.constant 0 : index
    %c0_20 = arith.constant 0 : index
    %18 = vector.load %arg3[%c0_17, %c2_18, %c0_19, %c0_20] : memref<1x8x16x128xbf16, #tpu.memory_space<vmem>>, vector<1x1x16x128xbf16>
    %19 = vector.shape_cast %18 : vector<1x1x16x128xbf16> to vector<16x128xbf16>
    %20 = arith.extf %19 : vector<16x128xbf16> to vector<16x128xf32>
    %21 = arith.mulf %17, %20 : vector<16x128xf32>
    %22 = arith.addf %14, %21 : vector<16x128xf32>
    %c0_21 = arith.constant 0 : index
    %c3 = arith.constant 3 : index
    %c0_22 = arith.constant 0 : index
    %c0_23 = arith.constant 0 : index
    %23 = vector.load %arg2[%c0_21, %c3, %c0_22, %c0_23] : memref<1x8x16x128xbf16, #tpu.memory_space<vmem>>, vector<1x1x16x128xbf16>
    %24 = vector.shape_cast %23 : vector<1x1x16x128xbf16> to vector<16x128xbf16>
    %25 = arith.extf %24 : vector<16x128xbf16> to vector<16x128xf32>
    %c0_24 = arith.constant 0 : index
    %c3_25 = arith.constant 3 : index
    %c0_26 = arith.constant 0 : index
    %c0_27 = arith.constant 0 : index
    %26 = vector.load %arg3[%c0_24, %c3_25, %c0_26, %c0_27] : memref<1x8x16x128xbf16, #tpu.memory_space<vmem>>, vector<1x1x16x128xbf16>
    %27 = vector.shape_cast %26 : vector<1x1x16x128xbf16> to vector<16x128xbf16>
    %28 = arith.extf %27 : vector<16x128xbf16> to vector<16x128xf32>
    %29 = arith.mulf %25, %28 : vector<16x128xf32>
    %30 = arith.addf %22, %29 : vector<16x128xf32>
    %c0_28 = arith.constant 0 : index
    %c4 = arith.constant 4 : index
    %c0_29 = arith.constant 0 : index
    %c0_30 = arith.constant 0 : index
    %31 = vector.load %arg2[%c0_28, %c4, %c0_29, %c0_30] : memref<1x8x16x128xbf16, #tpu.memory_space<vmem>>, vector<1x1x16x128xbf16>
    %32 = vector.shape_cast %31 : vector<1x1x16x128xbf16> to vector<16x128xbf16>
    %33 = arith.extf %32 : vector<16x128xbf16> to vector<16x128xf32>
    %c0_31 = arith.constant 0 : index
    %c4_32 = arith.constant 4 : index
    %c0_33 = arith.constant 0 : index
    %c0_34 = arith.constant 0 : index
    %34 = vector.load %arg3[%c0_31, %c4_32, %c0_33, %c0_34] : memref<1x8x16x128xbf16, #tpu.memory_space<vmem>>, vector<1x1x16x128xbf16>
    %35 = vector.shape_cast %34 : vector<1x1x16x128xbf16> to vector<16x128xbf16>
    %36 = arith.extf %35 : vector<16x128xbf16> to vector<16x128xf32>
    %37 = arith.mulf %33, %36 : vector<16x128xf32>
    %38 = arith.addf %30, %37 : vector<16x128xf32>
    %c0_35 = arith.constant 0 : index
    %c5 = arith.constant 5 : index
    %c0_36 = arith.constant 0 : index
    %c0_37 = arith.constant 0 : index
    %39 = vector.load %arg2[%c0_35, %c5, %c0_36, %c0_37] : memref<1x8x16x128xbf16, #tpu.memory_space<vmem>>, vector<1x1x16x128xbf16>
    %40 = vector.shape_cast %39 : vector<1x1x16x128xbf16> to vector<16x128xbf16>
    %41 = arith.extf %40 : vector<16x128xbf16> to vector<16x128xf32>
    %c0_38 = arith.constant 0 : index
    %c5_39 = arith.constant 5 : index
    %c0_40 = arith.constant 0 : index
    %c0_41 = arith.constant 0 : index
    %42 = vector.load %arg3[%c0_38, %c5_39, %c0_40, %c0_41] : memref<1x8x16x128xbf16, #tpu.memory_space<vmem>>, vector<1x1x16x128xbf16>
    %43 = vector.shape_cast %42 : vector<1x1x16x128xbf16> to vector<16x128xbf16>
    %44 = arith.extf %43 : vector<16x128xbf16> to vector<16x128xf32>
    %45 = arith.mulf %41, %44 : vector<16x128xf32>
    %46 = arith.addf %38, %45 : vector<16x128xf32>
    %c0_42 = arith.constant 0 : index
    %c6 = arith.constant 6 : index
    %c0_43 = arith.constant 0 : index
    %c0_44 = arith.constant 0 : index
    %47 = vector.load %arg2[%c0_42, %c6, %c0_43, %c0_44] : memref<1x8x16x128xbf16, #tpu.memory_space<vmem>>, vector<1x1x16x128xbf16>
    %48 = vector.shape_cast %47 : vector<1x1x16x128xbf16> to vector<16x128xbf16>
    %49 = arith.extf %48 : vector<16x128xbf16> to vector<16x128xf32>
    %c0_45 = arith.constant 0 : index
    %c6_46 = arith.constant 6 : index
    %c0_47 = arith.constant 0 : index
    %c0_48 = arith.constant 0 : index
    %50 = vector.load %arg3[%c0_45, %c6_46, %c0_47, %c0_48] : memref<1x8x16x128xbf16, #tpu.memory_space<vmem>>, vector<1x1x16x128xbf16>
    %51 = vector.shape_cast %50 : vector<1x1x16x128xbf16> to vector<16x128xbf16>
    %52 = arith.extf %51 : vector<16x128xbf16> to vector<16x128xf32>
    %53 = arith.mulf %49, %52 : vector<16x128xf32>
    %54 = arith.addf %46, %53 : vector<16x128xf32>
    %c0_49 = arith.constant 0 : index
    %c7 = arith.constant 7 : index
    %c0_50 = arith.constant 0 : index
    %c0_51 = arith.constant 0 : index
    %55 = vector.load %arg2[%c0_49, %c7, %c0_50, %c0_51] : memref<1x8x16x128xbf16, #tpu.memory_space<vmem>>, vector<1x1x16x128xbf16>
    %56 = vector.shape_cast %55 : vector<1x1x16x128xbf16> to vector<16x128xbf16>
    %57 = arith.extf %56 : vector<16x128xbf16> to vector<16x128xf32>
    %c0_52 = arith.constant 0 : index
    %c7_53 = arith.constant 7 : index
    %c0_54 = arith.constant 0 : index
    %c0_55 = arith.constant 0 : index
    %58 = vector.load %arg3[%c0_52, %c7_53, %c0_54, %c0_55] : memref<1x8x16x128xbf16, #tpu.memory_space<vmem>>, vector<1x1x16x128xbf16>
    %59 = vector.shape_cast %58 : vector<1x1x16x128xbf16> to vector<16x128xbf16>
    %60 = arith.extf %59 : vector<16x128xbf16> to vector<16x128xf32>
    %61 = arith.mulf %57, %60 : vector<16x128xf32>
    %62 = arith.addf %54, %61 : vector<16x128xf32>
    %cst = arith.constant 1.250000e-01 : f32
    %63 = vector.broadcast %cst : f32 to vector<16x128xf32>
    %64 = arith.mulf %62, %63 : vector<16x128xf32>
    %cst_56 = arith.constant dense<0.000000e+00> : vector<16xf32>
    %65 = vector.multi_reduction <add>, %64, %cst_56 [1] : vector<16x128xf32> to vector<16xf32>
    %66 = vector.shape_cast %65 : vector<16xf32> to vector<16x1xf32>
    %cst_57 = arith.constant 1.000000e-30 : f32
    %67 = vector.broadcast %cst_57 : f32 to vector<16x1xf32>
    %68 = arith.addf %66, %67 : vector<16x1xf32>
    %69 = vector.broadcast %68 : vector<16x1xf32> to vector<16x128xf32>
    %70 = arith.divf %64, %69 : vector<16x128xf32>
    %71 = arith.truncf %70 : vector<16x128xf32> to vector<16x128xbf16>
    %c0_58 = arith.constant 0 : index
    %c0_59 = arith.constant 0 : index
    %c0_60 = arith.constant 0 : index
    %72 = vector.load %arg4[%c0_58, %c0_59, %c0_60] : memref<1x128x128xbf16, #tpu.memory_space<vmem>>, vector<1x128x128xbf16>
    %73 = vector.shape_cast %72 : vector<1x128x128xbf16> to vector<128x128xbf16>
    %cst_61 = arith.constant dense<0.000000e+00> : vector<16x128xf32>
    %74 = tpu.matmul %71, %73, %cst_61 {dimension_numbers = #tpu.dot_dimension_numbers<[1], [0], [0], [1], [0, 0, 1, 1], [], []>} : vector<16x128xbf16>, vector<128x128xbf16>, vector<16x128xf32> -> vector<16x128xf32>
    %c0_62 = arith.constant 0 : index
    %c0_63 = arith.constant 0 : index
    %c0_64 = arith.constant 0 : index
    %75 = vector.load %arg6[%c0_62, %c0_63, %c0_64] : memref<1x16x128xf32, #tpu.memory_space<vmem>>, vector<1x16x128xf32>
    %76 = vector.shape_cast %75 : vector<1x16x128xf32> to vector<16x128xf32>
    %77 = vector.shape_cast %74 : vector<16x128xf32> to vector<1x16x128xf32>
    tpu.vector_store %arg6[%c0_62, %c0_63, %c0_64], %77 {strides = array<i32>} : memref<1x16x128xf32, #tpu.memory_space<vmem>>, vector<1x16x128xf32>,
    %c0_65 = arith.constant 0 : index
    %c0_66 = arith.constant 0 : index
    %c0_67 = arith.constant 0 : index
    %78 = vector.load %arg5[%c0_65, %c0_66, %c0_67] : memref<1x128x128xbf16, #tpu.memory_space<vmem>>, vector<1x128x128xbf16>
    %79 = vector.shape_cast %78 : vector<1x128x128xbf16> to vector<128x128xbf16>
    %cst_68 = arith.constant dense<0.000000e+00> : vector<16x128xf32>
    %80 = tpu.matmul %71, %79, %cst_68 {dimension_numbers = #tpu.dot_dimension_numbers<[1], [0], [0], [1], [0, 0, 1, 1], [], []>} : vector<16x128xbf16>, vector<128x128xbf16>, vector<16x128xf32> -> vector<16x128xf32>
    %c0_69 = arith.constant 0 : index
    %c0_70 = arith.constant 0 : index
    %c0_71 = arith.constant 0 : index
    %81 = vector.load %arg7[%c0_69, %c0_70, %c0_71] : memref<1x16x128xf32, #tpu.memory_space<vmem>>, vector<1x16x128xf32>
    %82 = vector.shape_cast %81 : vector<1x16x128xf32> to vector<16x128xf32>
    %83 = vector.shape_cast %80 : vector<16x128xf32> to vector<1x16x128xf32>
    tpu.vector_store %arg7[%c0_69, %c0_70, %c0_71], %83 {strides = array<i32>} : memref<1x16x128xf32, #tpu.memory_space<vmem>>, vector<1x16x128xf32>,
    return
  }
  func.func @transform_0(%arg0: i32, %arg1: i32) -> (i32, i32, i32, i32) {
    %c0_i32 = arith.constant 0 : i32
    %c0_i32_0 = arith.constant 0 : i32
    %c0_i32_1 = arith.constant 0 : i32
    return %arg0, %c0_i32, %arg1, %c0_i32_0 : i32, i32, i32, i32
  }
  func.func @transform_1(%arg0: i32, %arg1: i32) -> (i32, i32, i32, i32) {
    %c0_i32 = arith.constant 0 : i32
    %c0_i32_0 = arith.constant 0 : i32
    %c0_i32_1 = arith.constant 0 : i32
    return %arg0, %c0_i32, %arg1, %c0_i32_0 : i32, i32, i32, i32
  }
  func.func @transform_2(%arg0: i32, %arg1: i32) -> (i32, i32, i32) {
    %c0_i32 = arith.constant 0 : i32
    %c0_i32_0 = arith.constant 0 : i32
    %c0_i32_1 = arith.constant 0 : i32
    return %arg0, %c0_i32, %c0_i32_0 : i32, i32, i32
  }
  func.func @transform_3(%arg0: i32, %arg1: i32) -> (i32, i32, i32) {
    %c0_i32 = arith.constant 0 : i32
    %c0_i32_0 = arith.constant 0 : i32
    %c0_i32_1 = arith.constant 0 : i32
    return %arg0, %c0_i32, %c0_i32_0 : i32, i32, i32
  }
  func.func @transform_4(%arg0: i32, %arg1: i32) -> (i32, i32, i32) {
    %c0_i32 = arith.constant 0 : i32
    %c0_i32_0 = arith.constant 0 : i32
    return %arg0, %arg1, %c0_i32 : i32, i32, i32
  }
  func.func @transform_5(%arg0: i32, %arg1: i32) -> (i32, i32, i32) {
    %c0_i32 = arith.constant 0 : i32
    %c0_i32_0 = arith.constant 0 : i32
    return %arg0, %arg1, %c0_i32 : i32, i32, i32
  }
}

</mosaic_0001>

<bundles_post_ra>
// kernel: tpu_custom_call.1
= control target key start
LH: loop header
LB: loop body
LE: loop exit
PB: predicated region body
PF: predicated region fallthrough
CT: control target
= control target key end

     0   :  { %s1906_s0 = inlined_call_operand.hbm [shape: bf16[2,8,16,128], index: 0, kind: input, shape index: {}]   ;;  %s1907_s1 = inlined_call_operand.hbm [shape: bf16[2,8,16,128], index: 1, kind: input, shape index: {}]   ;;  %s1908_s2 = inlined_call_operand.hbm [shape: bf16[2,128,128], index: 2, kind: input, shape index: {}]   ;;  %s1909_s3 = inlined_call_operand.hbm [shape: bf16[2,128,128], index: 3, kind: input, shape index: {}]   ;;  %s1910_s4 = inlined_call_operand.hbm [shape: f32[2,16,128], index: 4, kind: output, shape index: {0}]   ;;  %s1911_s5 = inlined_call_operand.hbm [shape: f32[2,16,128], index: 5, kind: output, shape index: {1}]  }
   0x1   :  { %1919 = sst [smem:[#allocation24_spill]] %s1907_s1 }
   0x2   :  { %11 = vsyncpa [#allocation3], 0 }
   0x3   :  { %13 = vsyncpa [#allocation3 + $0x1], 0 }
   0x4   :  { %14 = vsyncpa [#allocation6], 0 }
   0x5   :  { %16 = vsyncpa [#allocation6 + $0x1], 0 }
   0x6   :  { %17 = vsyncpa [#allocation9], 0 }
   0x7   :  { %19 = vsyncpa [#allocation9 + $0x1], 0 }
   0x8   :  { %20 = vsyncpa [#allocation4], 0 }
   0x9   :  { %22 = vsyncpa [#allocation4 + $0x1], 0 }
   0xa   :  { %23 = vsyncpa [#allocation12], 0 }
   0xb   :  { %25 = vsyncpa [#allocation12 + $0x1], 0  ;;  %s1589_s18 = smov 0   ;;  %s1591_s19 = smov 0  }
   0xc   :  { %s1593_s20 = smov 0   ;;  %s1595_s21 = smov 0  }
   0xd   :  { %s1597_s22 = smov 0   ;;  %s1599_s23 = smov 0  }
   0xe LB: > { %1920 = sst [smem:[#allocation18_spill]] %s1524_s18  ;;  %s1620_s24 = sadd.s32 4294967295, %s1544_s23   ;;  %s1544_s23 = sphi %s1599_s23, %s31_s23   ;;  %s1540_s22 = sphi %s1597_s22, %s1940_s22   ;;  %s1536_s21 = sphi %s1595_s21, %s1939_s21   ;;  %s1532_s20 = sphi %s1593_s20, %s1938_s20   ;;  %s1528_s19 = sphi %s1591_s19, %s1942_s19   ;;  %s1524_s18 = sphi %s1589_s18, %s1941_s18  }
   0xf   : > { %1921 = sst [smem:[#allocation19_spill]] %s1532_s20  ;;  %s966_s25 = sadd.s32 4294967294, %s1544_s23  }
  0x10   : > { %1922 = sst [smem:[#allocation20_spill]] %s1540_s22  ;;  %s43_s26 = sadd.s32 1, %s1540_s22 }
  0x11   : > { %s52_s27 = sadd.s32 1, %s1532_s20  ;;  %p45_p0 = scmp.ge.s32.totalorder %s43_s26, 2 }
  0x12   : > { %p59_p1 = scmp.ne.s32.totalorder %s1532_s20, %s1528_s19  ;;  %p60_p2 = scmp.eq.s32.totalorder %s1544_s23, 0 }
  0x13   : > { %p65_p3 = scmp.ne.s32.totalorder %s1528_s19, %s1524_s18  ;;  %s1944_s26 = smov (%p45_p0, %s43_s26), 0 }
  0x14   : > { %1923 = sst [smem:[#allocation21_spill]] %s1944_s26  ;;  %p1632_p4 = por %p60_p2, %p59_p1 }
  0x15   : > { %p66_p5 = scmp.eq.s32.totalorder %s1620_s24, 0  ;;  %s47_s29 = ssub.s32 %s1540_s22, %s1944_s26 }
  0x16   : > { %p171_p6 = scmp.eq.s32.totalorder %s1620_s24, 1  ;;  %p50_p7 = scmp.eq.s32.totalorder %s47_s29, 0 }
  0x17   : > { %p1640_p8 = por %p66_p5, %p65_p3  ;;  %p177_p10 = scmp.eq.s32.totalorder %s966_s25, 1 }
  0x18   : > { %p1644_p9 = por %p171_p6, %p59_p1  ;;  %p1214_p13 = scmp.lt.s32.totalorder %s1544_s23, 2 }
  0x19   : > { %s1649_s7 = scalar_select %p50_p7, %s1532_s20, %s52_s27  }
  0x1a   : > { %p1651_p11 = por %p177_p10, %p65_p3  ;;  %s1658_s9 = sand.u32 1, %s1532_s20  }
  0x1b   : > { %1927 = sst [smem:[#allocation22_spill]] %s1649_s7  ;;  %s1661_s10 = sshll.u32 %s1658_s9, 6 }
  0x1c   : > { %s1928_s8 = scalar_select %p1651_p11, 1, 0 }
  0x1d   : > { %s1664_s11 = sshll.u32 %s1540_s22, 10  ;;  %p1668_p0 = pnand %p1214_p13, %p1632_p4 }
  0x1e   : > { %1929 = sst [smem:[#allocation23_spill]] %s1928_s8  ;;  %s248_s13 = sand.u32 1, %s1544_s23  }
  0x1f   : > { %s1931_s1 = sld [smem:[#allocation24_spill]]  ;;  %s252_s17 = scalar_lea.vmem [#allocation5], %s1661_s10 }
  0x20   : > { %s261_s25 = sshll.u32 %s252_s17, 4  ;;  %p981_p1 = scmp.ge.s32.totalorder %s1544_s23, 1  ;;  %s262_s25 = int_to_ptr.vmem [resolvable:$true] %s261_s25 }
  0x21   : > { %p311_p2 = scmp.lt.s32.totalorder %s1544_s23, 3  ;;  %s1680_s27 = scalar_lea.sflag [#allocation6], %s248_s13 }
  0x22   : > { %p1292_p3 = pneg %p1668_p0  ;;  %s1303_s28 = scalar_lea.vmem %s262_s25, 1024 }
  0x23   : > { %p1304_p4 = scmp.ne.s32.totalorder %s262_s25, %s1303_s28  ;;  %s1546_s29 = smov [#allocation5]  }
  0x24   : > { %s1308_s26 = sshll.u32 %s1546_s29, 4  ;;  %s1309_s26 = int_to_ptr.vmem [resolvable:$false] %s1308_s26 }
  0x25   : > { %s260_s16 = scalar_lea.hbm %s1931_s1, %s1664_s11  ;;  %p1306_p5 = pnand %p1304_p4, %p1292_p3 }
  0x26   : > { %s1310_s14 = scalar_lea.vmem %s1309_s26, 2048  ;;  %p1311_p7 = scmp.lt.s32.totalorder %s262_s25, %s1309_s26 }
  0x27   : > { %p1307_p6 = pneg %p1306_p5  ;;  %p1312_p10 = scmp.lt.s32.totalorder %s1310_s14, %s1303_s28 }
  0x29   : > { %p1313_p13 = por %p1312_p10, %p1311_p7 }
  0x2b   : > { %p1314_p12 = pnand %p1313_p13, %p1307_p6 }
  0x2d   : > { %1317 = shalt.err (!%p1314_p12)
}
  0x2e   : > { %s1917_s15 = smov 64   ;;  %s1548_s13 = smov 4  }
  0x2f   : > { %1200 = dma.hbm_to_vmem [thread:$0]  (!%p1668_p0), %s260_s16, 1024, %s262_s25, %s1680_s27, %s1917_s15, %s1917_s15, %s1548_s13  }
  0x30   : > { %p1697_p4 = pnand %p981_p1, %p311_p2  ;;  %s237_s29 = scalar_lea.hbm %s1906_s0, %s1664_s11 }
  0x31   : > { %s229_s14 = scalar_lea.vmem [#allocation2], %s1661_s10  ;;  %s281_s20 = scalar_lea.hbm %s1908_s2, %s1664_s11 }
  0x32   : > { %s238_s1 = sshll.u32 %s229_s14, 4  ;;  %s226_s8 = scalar_lea.sflag [#allocation3], %s1658_s9  ;;  %s239_s1 = int_to_ptr.vmem [resolvable:$true] %s238_s1 }
  0x33   : > { %s1331_s18 = scalar_lea.vmem %s239_s1, 1024  ;;  %s1549_s16 = smov [#allocation2]  }
  0x34   : > { %p1332_p12 = scmp.ne.s32.totalorder %s239_s1, %s1331_s18  ;;  %s1336_s25 = sshll.u32 %s1549_s16, 4  ;;  %s1337_s25 = int_to_ptr.vmem [resolvable:$false] %s1336_s25 }
  0x35   : > { %s1338_s15 = scalar_lea.vmem %s1337_s25, 2048  ;;  %p1339_p5 = scmp.lt.s32.totalorder %s239_s1, %s1337_s25 }
  0x36   : > { %p1334_p1 = pnand %p1332_p12, %p1292_p3  ;;  %p1340_p6 = scmp.lt.s32.totalorder %s1338_s15, %s1331_s18 }
  0x38   : > { %p1335_p2 = pneg %p1334_p1  ;;  %p1341_p7 = por %p1340_p6, %p1339_p5 }
  0x3a   : > { %p1342_p10 = pnand %p1341_p7, %p1335_p2 }
  0x3c   : > { %1345 = shalt.err (!%p1342_p10)
}
  0x3d   : > { %s1933_s22 = smov 64   ;;  %s275_s7 = scalar_lea.vmem [#allocation7], %s1661_s10 }
  0x3e   : > { %1197 = dma.hbm_to_vmem [thread:$0]  (!%p1668_p0), %s237_s29, 1024, %s239_s1, %s226_s8, %s1933_s22, %s1933_s22, %s1548_s13  }
  0x3f   : > { %s282_s17 = sshll.u32 %s275_s7, 4  ;;  %s1550_s18 = smov [#allocation7]   ;;  %s283_s17 = int_to_ptr.vmem [resolvable:$true] %s282_s17 }
  0x40   : > { %s1359_s28 = scalar_lea.vmem %s283_s17, 1024  ;;  %s1364_s15 = sshll.u32 %s1550_s18, 4  ;;  %s1365_s15 = int_to_ptr.vmem [resolvable:$false] %s1364_s15 }
  0x41   : > { %p1360_p13 = scmp.ne.s32.totalorder %s283_s17, %s1359_s28  ;;  %s1366_s14 = scalar_lea.vmem %s1365_s15, 2048 }
  0x42   : > { %p1367_p2 = scmp.lt.s32.totalorder %s283_s17, %s1365_s15  ;;  %p1368_p5 = scmp.lt.s32.totalorder %s1366_s14, %s1359_s28 }
  0x43   : > { %p1362_p12 = pnand %p1360_p13, %p1292_p3 }
  0x44   : > { %p1369_p6 = por %p1368_p5, %p1367_p2 }
  0x45   : > { %p1363_p1 = pneg %p1362_p12 }
  0x47   : > { %p1370_p7 = pnand %p1369_p6, %p1363_p1 }
  0x49   : > { %1373 = shalt.err (!%p1370_p7)
}
  0x4a   : > { %1203 = dma.hbm_to_vmem [thread:$0]  (!%p1668_p0), %s281_s20, 1024, %s283_s17, %s1680_s27, %s1933_s22, %s1933_s22, %s1548_s13  }
  0x4b   : > { %s302_s25 = scalar_lea.hbm %s1909_s3, %s1664_s11  ;;  %s296_s7 = scalar_lea.vmem [#allocation8], %s1661_s10 }
  0x4c   : > { %s303_s28 = sshll.u32 %s296_s7, 4  ;;  %s293_s18 = scalar_lea.sflag [#allocation9], %s1658_s9  ;;  %s304_s28 = int_to_ptr.vmem [resolvable:$true] %s303_s28 }
  0x4d   : > { %s1387_s15 = scalar_lea.vmem %s304_s28, 1024  ;;  %s1551_s14 = smov [#allocation8]  }
  0x4e   : > { %p1388_p10 = scmp.ne.s32.totalorder %s304_s28, %s1387_s15  ;;  %s1392_s1 = sshll.u32 %s1551_s14, 4  ;;  %s1393_s1 = int_to_ptr.vmem [resolvable:$false] %s1392_s1 }
  0x4f   : > { %s1394_s8 = scalar_lea.vmem %s1393_s1, 2048  ;;  %p1395_p1 = scmp.lt.s32.totalorder %s304_s28, %s1393_s1 }
  0x50   : > { %p1390_p13 = pnand %p1388_p10, %p1292_p3  ;;  %p1396_p2 = scmp.lt.s32.totalorder %s1394_s8, %s1387_s15 }
  0x52   : > { %p1391_p12 = pneg %p1390_p13  ;;  %p1397_p5 = por %p1396_p2, %p1395_p1 }
  0x54   : > { %p1398_p6 = pnand %p1397_p5, %p1391_p12 }
  0x56   : > { %1401 = shalt.err (!%p1398_p6)
}
  0x57   : > { %1206 = dma.hbm_to_vmem [thread:$0]  (!%p1668_p0), %s302_s25, 1024, %s304_s28, %s293_s18, %s1933_s22, %s1933_s22, %s1548_s13  }
  0x58   : > { %315 = sbr.rel (%p1697_p4) target bundleno = 516 (0x204), region = 36  ;;  %s1751_s20 = sand.u32 (!%p1697_p4), 1, %s1528_s19  }
  0x59   : > { %s982_s9 = sshll.u32 (!%p1697_p4), %s1751_s20, 6  ;;  %s318_s10 = scalar_lea.sflag (!%p1697_p4), [#allocation3], %s1751_s20 }
  0x5a   : > { %s1755_s11 = scalar_lea.vmem (!%p1697_p4), [#allocation2], %s982_s9 }
  0x5d   : > { %1479 = dma.done.wait (%p1640_p8), %s318_s10, 1024  }
  0x5e   : > { %1481 = vsyncadd (%p1640_p8), %s318_s10, 4294966272  ;;  %s326_s12 = sand.u32 1, %s1620_s24   ;;  %s330_s13 = scalar_lea.vmem [#allocation5], %s982_s9 }
  0x5f   : > { %s327_s27 = scalar_lea.sflag [#allocation6], %s326_s12 }
  0x60   : > { %1483 = dma.done.wait (%p1640_p8), %s327_s27, 2048  }
  0x61   : > { %1485 = vsyncadd (%p1640_p8), %s327_s27, 4294965248  ;;  %s1766_s26 = scalar_lea.vmem [#allocation7], %s982_s9  ;;  %s345_s22 = scalar_lea.sflag [#allocation9], %s1751_s20 }
  0x62   : > { %s1769_s17 = scalar_lea.vmem [#allocation8], %s982_s9 }
  0x63   : > { %1487 = dma.done.wait (%p1640_p8), %s345_s22, 1024  }
  0x64   : > { %1489 = vsyncadd (%p1640_p8), %s345_s22, 4294966272  ;;  %v1552_v0 = vmov 0.0   ;;  %v1047_v1 = vld [vmem:[%s1755_s11] sm:$0xff]   ;;  %v1110_v3 = vld [vmem:[%s1755_s11 + $0x8] sm:$0xff]   ;;  %v1553_v25 = vmov 1935823168   ;;  %v1512_v28 = vlaneseq }
  0x65   : > { %1142 = vmatprep.subr.bf16.mxu0 %v1552_v0  ;;  %1162 = vmatprep.subr.bf16.mxu1 %v1552_v0  ;;  %v1051_v2 = vld [vmem:[%s330_s13] sm:$0xff]   ;;  %v1111_v4 = vld [vmem:[%s330_s13 + $0x8] sm:$0xff]   ;;  %v1112_v5 = vld [vmem:[%s1755_s11 + $0x10] sm:$0xff]   ;;  %v1510_v26 = vunpack.c.l.s4 %v1553_v25  ;;  %vm1554_vm0 = vmmov 0   ;;  %s986_s24 = sshll.u32 %s1751_s20, 4  ;;  %s1044_s7 = sshll.u32 %s1536_s21, 8 }
  0x66   : > { %v1113_v6 = vld [vmem:[%s330_s13 + $0x10] sm:$0xff]   ;;  %v1114_v7 = vld [vmem:[%s1755_s11 + $0x18] sm:$0xff]   ;;  %v1116_v9 = vld [vmem:[%s1755_s11 + $0x20] sm:$0xff]   ;;  %1498 = vmul.bf16.f32.vacc0 %v1051_v2, %v1047_v1  ;;  %v1513_v29 = vshrl.u32 %v1512_v28, 7  ;;  %1158 = vmatprep.mubr.msk.bf16.mxu0 %vm1554_vm0, %v1552_v0  ;;  %1178 = vmatprep.mubr.msk.bf16.mxu1 %vm1554_vm0, %v1552_v0  ;;  %s387_s30 = scalar_lea.vmem [#allocation10], %s986_s24  ;;  %s394_s16 = scalar_lea.vmem [#allocation11], %s986_s24 }
  0x67   : > { %v1115_v8 = vld [vmem:[%s330_s13 + $0x18] sm:$0xff]   ;;  %v1117_v10 = vld [vmem:[%s330_s13 + $0x20] sm:$0xff]   ;;  %v1118_v11 = vld [vmem:[%s1755_s11 + $0x28] sm:$0xff]   ;;  %1499 = vmac.bf16.f32.vacc0 %v1111_v4, %v1110_v3  ;;  %v1511_v27 = vunpack.c.0.s8 %v1510_v26  ;;  %s756_s29 = sshll.u32 %s387_s30, 4  ;;  %s774_s25 = sshll.u32 %s394_s16, 4  ;;  %s1819_s29 = int_to_ptr.vmem [resolvable:$true] %s756_s29  ;;  %s1821_s25 = int_to_ptr.vmem [resolvable:$true] %s774_s25 }
  0x68   : > { %v1119_v12 = vld [vmem:[%s330_s13 + $0x28] sm:$0xff]   ;;  %v1120_v13 = vld [vmem:[%s1755_s11 + $0x30] sm:$0xff]   ;;  %v1122_v15 = vld [vmem:[%s1755_s11 + $0x38] sm:$0xff]   ;;  %1500 = vmac.bf16.f32.vacc0 %v1113_v6, %v1112_v5  ;;  %s1826_s15 = scalar_lea.hbm %s1910_s4, %s1044_s7  ;;  %s1831_s1 = scalar_lea.hbm %s1911_s5, %s1044_s7 }
  0x69   : > { %v1121_v14 = vld [vmem:[%s330_s13 + $0x30] sm:$0xff]   ;;  %v1123_v16 = vld [vmem:[%s330_s13 + $0x38] sm:$0xff]   ;;  %1501 = vmac.bf16.f32.vacc0 %v1115_v8, %v1114_v7  ;;  %v1514_v30 = vsub.s32 %v1511_v27, %v1513_v29  ;;  %v1274_v35 = vld [vmem:[%s1766_s26 + $0x28] sm:$0xff]   ;;  %s736_s8 = scalar_lea.sflag [#allocation4], %s1751_s20  ;;  %s1402_s9 = scalar_lea.vmem %s1819_s29, 256 }
  0x6a   : > { %v1270_v17 = vld [vmem:[%s1766_s26 + $0x38] sm:$0xff]   ;;  %v1272_v19 = vld [vmem:[%s1766_s26 + $0x30] sm:$0xff]   ;;  %1502 = vmac.bf16.f32.vacc0 %v1117_v10, %v1116_v9  ;;  %v1275_v36 = vld [vmem:[%s1769_s17 + $0x28] sm:$0xff]   ;;  %p1403_p8 = scmp.ne.s32.totalorder %s1819_s29, %s1402_s9  ;;  %s1555_s10 = smov [#allocation10]  }
  0x6b   : > { %v1271_v18 = vld [vmem:[%s1769_s17 + $0x38] sm:$0xff]   ;;  %1143 = vmatpush3.bf16.msra.mxu0 %v1270_v17  ;;  %v1273_v20 = vld [vmem:[%s1769_s17 + $0x30] sm:$0xff]   ;;  %1503 = vmac.bf16.f32.vacc0 %v1119_v12, %v1118_v11  ;;  %v1276_v37 = vld [vmem:[%s1766_s26 + $0x20] sm:$0xff]   ;;  %s1406_s11 = sshll.u32 %s1555_s10, 4  ;;  %s1407_s11 = int_to_ptr.vmem [resolvable:$false] %s1406_s11 }
  0x6c   : > { %1163 = vmatpush3.bf16.msra.mxu1 %v1271_v18  ;;  %1144 = vmatprep.subr.bf16.mxu0 %v1552_v0  ;;  %1504 = vmac.bf16.f32.vacc0 %v1121_v14, %v1120_v13  ;;  %v1277_v38 = vld [vmem:[%s1769_s17 + $0x20] sm:$0xff]   ;;  %v1278_v39 = vld [vmem:[%s1766_s26 + $0x18] sm:$0xff]   ;;  %v1280_v41 = vld [vmem:[%s1766_s26 + $0x10] sm:$0xff]   ;;  %p1404_p0 = pnand %p1403_p8, %p1644_p9  ;;  %s1408_s12 = scalar_lea.vmem %s1407_s11, 512 }
  0x6d   : > { %1164 = vmatprep.subr.bf16.mxu1 %v1552_v0  ;;  %1505 = vmac.bf16.f32.vacc0 %v1123_v16, %v1122_v15  ;;  %v1279_v40 = vld [vmem:[%s1769_s17 + $0x18] sm:$0xff]   ;;  %v1281_v42 = vld [vmem:[%s1769_s17 + $0x10] sm:$0xff]   ;;  %v1282_v43 = vld [vmem:[%s1766_s26 + $0x8] sm:$0xff]   ;;  %p1409_p4 = scmp.lt.s32.totalorder %s1819_s29, %s1407_s11  ;;  %p1410_p7 = scmp.lt.s32.totalorder %s1408_s12, %s1402_s9 }
  0x6e   : > { %v1283_v44 = vld [vmem:[%s1769_s17 + $0x8] sm:$0xff]   ;;  %v1284_v45 = vld [vmem:[%s1766_s26] sm:$0xff]   ;;  %p1405_p3 = pneg %p1404_p0 }
  0x6f   : > { %1145 = vmatpush3.bf16.msra.mxu0 %v1272_v19  ;;  %v1506_v21 = vmovacc.add.low.vacc0  ;;  %v1285_v46 = vld [vmem:[%s1769_s17] sm:$0xff]   ;;  %p1411_p10 = por %p1410_p7, %p1409_p4 }
  0x70   : > { %1165 = vmatpush3.bf16.msra.mxu1 %v1273_v20  ;;  %1146 = vmatprep.subr.bf16.mxu0 %v1552_v0  ;;  %v1507_v22 = vmovacc.add.high.vacc0 }
  0x71   : > { %1166 = vmatprep.subr.bf16.mxu1 %v1552_v0  ;;  %p1412_p13 = pnand %p1411_p10, %p1405_p3 }
  0x72   : > { %v1508_v23 = vcombine.low %v1506_v21, %v1507_v22  ;;  %v1509_v24 = vcombine.high %v1506_v21, %v1507_v22 }
  0x73   : > { %1147 = vmatpush3.bf16.msra.mxu0 %v1274_v35 }
  0x74   : > { %v1515_v31 = vrot.slane %v1508_v23, %v1514_v30  ;;  %v1521_v32 = vrot.slane %v1509_v24, %v1514_v30  ;;  %1167 = vmatpush3.bf16.msra.mxu1 %v1275_v36  ;;  %1148 = vmatprep.subr.bf16.mxu0 %v1552_v0 }
  0x75   : > { %1168 = vmatprep.subr.bf16.mxu1 %v1552_v0 }
  0x76   : > { %v508_v33 = vmul.f32 0.125, %v1515_v31  ;;  %v509_v34 = vmul.f32 0.125, %v1521_v32 }
  0x77   : > { %1149 = vmatpush3.bf16.msra.mxu0 %v1276_v37 }
  0x78   : > { %510 = vadd.xlane.f32.xlu0 %v508_v33  ;;  %1169 = vmatpush3.bf16.msra.mxu1 %v1277_v38 }
  0x79   : > { %1150 = vmatprep.subr.bf16.mxu0 %v1552_v0  ;;  %1170 = vmatprep.subr.bf16.mxu1 %v1552_v0 }
  0x7b   : > { %1151 = vmatpush3.bf16.msra.mxu0 %v1278_v39 }
  0x7c   : > { %512 = vadd.xlane.f32.xlu0 %v509_v34  ;;  %1171 = vmatpush3.bf16.msra.mxu1 %v1279_v40 }
  0x7d   : > { %1152 = vmatprep.subr.bf16.mxu0 %v1552_v0  ;;  %1172 = vmatprep.subr.bf16.mxu1 %v1552_v0 }
  0x7f   : > { %1153 = vmatpush3.bf16.msra.mxu0 %v1280_v41 }
  0x80   : > { %1173 = vmatpush3.bf16.msra.mxu1 %v1281_v42  ;;  %1154 = vmatprep.subr.bf16.mxu0 %v1552_v0 }
  0x81   : > { %1174 = vmatprep.subr.bf16.mxu1 %v1552_v0 }
  0x83   : > { %1155 = vmatpush3.bf16.msra.mxu0 %v1282_v43 }
  0x84   : > { %1175 = vmatpush3.bf16.msra.mxu1 %v1283_v44  ;;  %1156 = vmatprep.subr.bf16.mxu0 %v1552_v0 }
  0x85   : > { %1176 = vmatprep.subr.bf16.mxu1 %v1552_v0 }
  0x87   : > { %1157 = vmatpush3.bf16.msra.mxu0 %v1284_v45 }
  0x88   : > { %1177 = vmatpush3.bf16.msra.mxu1 %v1285_v46 }
 0x101   : > { %v511_v47 = vpop.xlane.xlu0 %510 }
 0x102   : > { %v514_v48 = vadd.f32 1e-30, %v511_v47 }
 0x104   : > { %1286 = vrcp.f32 %v514_v48 }
 0x105   : > { %v513_v49 = vpop.xlane.xlu0 %512 }
 0x106   : > { %v515_v50 = vadd.f32 1e-30, %v513_v49 }
 0x108   : > { %1288 = vrcp.f32 %v515_v50 }
 0x111   : > { %v1287_v51 = vpop.eup %1286 }
 0x112   : > { %v517_v53 = vmul.f32 %v1287_v51, %v508_v33 }
 0x115   : > { %v1289_v52 = vpop.eup %1288 }
 0x116   : > { %v519_v54 = vmul.f32 %v1289_v52, %v509_v34 }
 0x118   : > { %v520_v55 = vpack.c.bf16 %v519_v54, %v517_v53 }
 0x11a   : > { %1159 = vmatmul.mubr.bf16.vlgmr.msra.gmra.mxu0 %v520_v55  ;;  %1179 = vmatmul.mubr.bf16.vlgmr.msra.gmra.mxu1 %v520_v55 }
 0x1da   : > { %v619_v56 = vpop.f32.mrf.mxu0  ;;  %v726_v57 = vpop.f32.mrf.mxu1 }
 0x1db   : > { %626 = vst [vmem:[%s387_s30] sm:$0xff] %v619_v56  ;;  %733 = vst [vmem:[%s394_s16] sm:$0xff] %v726_v57 }
 0x1dc   : > { %v1160_v58 = vpop.f32.mrf.mxu0  ;;  %v1180_v59 = vpop.f32.mrf.mxu1 }
 0x1de   : > { %v622_v60 = vpop.f32.mrf.mxu0  ;;  %v729_v61 = vpop.f32.mrf.mxu1 }
 0x1df   : > { %627 = vst [vmem:[%s387_s30 + $0x8] sm:$0xff] %v622_v60  ;;  %734 = vst [vmem:[%s394_s16 + $0x8] sm:$0xff] %v729_v61 }
 0x1e0   : > { %v1161_v62 = vpop.f32.mrf.mxu0  ;;  %v1181_v63 = vpop.f32.mrf.mxu1 }
 0x1e1   : > { %1415 = shalt.err (!%p1412_p13)
}
 0x1e2   : > { %s1416_s27 = scalar_lea.hbm %s1826_s15, 256  ;;  %s1420_s22 = scalar_lea.hbm %s1910_s4, 512 }
 0x1e3   : > { %p1417_p12 = scmp.ne.s32.totalorder %s1826_s15, %s1416_s27  ;;  %p1421_p5 = scmp.lt.s32.totalorder %s1826_s15, %s1910_s4 }
 0x1e4   : > { %p1422_p6 = scmp.lt.s32.totalorder %s1420_s22, %s1416_s27 }
 0x1e5   : > { %p1418_p1 = pnand %p1417_p12, %p1644_p9 }
 0x1e6   : > { %p1423_p8 = por %p1422_p6, %p1421_p5 }
 0x1e7   : > { %p1419_p2 = pneg %p1418_p1 }
 0x1e9   : > { %p1424_p0 = pnand %p1423_p8, %p1419_p2 }
 0x1eb   : > { %1427 = shalt.err (!%p1424_p0)
}
 0x1ec   : > { %s1556_s30 = smov 128   ;;  %s1557_s16 = smov 8  }
 0x1ed   : > { %1190 = dma.vmem_to_hbm [thread:$0]  (%p1644_p9), %s1819_s29, 256, %s1826_s15, %s736_s8, %s1556_s30, %s1556_s30, %s1557_s16  }
 0x1ee   : > { %s741_s7 = scalar_lea.sflag [#allocation12], %s1751_s20  ;;  %s1428_s28 = scalar_lea.vmem %s1821_s25, 256 }
 0x1ef   : > { %p1429_p3 = scmp.ne.s32.totalorder %s1821_s25, %s1428_s28  ;;  %s1558_s18 = smov [#allocation11]  }
 0x1f0   : > { %s1432_s21 = sshll.u32 %s1558_s18, 4  ;;  %s1433_s21 = int_to_ptr.vmem [resolvable:$false] %s1432_s21 }
 0x1f1   : > { %p1430_p4 = pnand %p1429_p3, %p1644_p9  ;;  %s1434_s14 = scalar_lea.vmem %s1433_s21, 512 }
 0x1f2   : > { %p1435_p10 = scmp.lt.s32.totalorder %s1821_s25, %s1433_s21  ;;  %p1436_p13 = scmp.lt.s32.totalorder %s1434_s14, %s1428_s28 }
 0x1f3   : > { %p1431_p7 = pneg %p1430_p4 }
 0x1f4   : > { %p1437_p12 = por %p1436_p13, %p1435_p10 }
 0x1f6   : > { %p1438_p1 = pnand %p1437_p12, %p1431_p7 }
 0x1f8   : > { %1441 = shalt.err (!%p1438_p1)
}
 0x1f9   : > { %s1442_s29 = scalar_lea.hbm %s1831_s1, 256  ;;  %s1446_s8 = scalar_lea.hbm %s1911_s5, 512 }
 0x1fa   : > { %p1443_p2 = scmp.ne.s32.totalorder %s1831_s1, %s1442_s29  ;;  %p1447_p8 = scmp.lt.s32.totalorder %s1831_s1, %s1911_s5 }
 0x1fb   : > { %p1448_p0 = scmp.lt.s32.totalorder %s1446_s8, %s1442_s29 }
 0x1fc   : > { %p1444_p5 = pnand %p1443_p2, %p1644_p9 }
 0x1fd   : > { %p1449_p3 = por %p1448_p0, %p1447_p8 }
 0x1fe   : > { %p1445_p6 = pneg %p1444_p5 }
 0x200   : > { %p1450_p4 = pnand %p1449_p3, %p1445_p6 }
 0x202   : > { %1453 = shalt.err (!%p1450_p4)
}
 0x203   : > { %1191 = dma.vmem_to_hbm [thread:$0]  (%p1644_p9), %s1821_s25, 256, %s1831_s1, %s741_s7, %s1556_s30, %s1556_s30, %s1557_s16  }
 0x204 PF: > { %s1934_s11 = sld [smem:[#allocation18_spill]]  ;;  %p1936_p7 = scmp.ge.s32.totalorder %s1544_s23, 2 }
 0x206   : > { %p1208_p10 = pnand %p1936_p7, %p1651_p11 }
 0x208   : > { %p1209_p13 = pneg %p1208_p10 }
 0x20a   : > { %s789_s27 = sand.u32 1, %s1934_s11  }
 0x20b   : > { %s790_s13 = scalar_lea.sflag [#allocation4], %s789_s27 }
 0x20c   : > { %1491 = dma.done.wait (%p1209_p13), %s790_s13, 256  }
 0x20d   : > { %1493 = vsyncadd (%p1209_p13), %s790_s13, 4294967040  ;;  %s799_s26 = scalar_lea.sflag [#allocation12], %s789_s27 }
 0x20e   : > { %1495 = dma.done.wait (%p1209_p13), %s799_s26, 256  }
 0x20f   : > { %1497 = vsyncadd (%p1209_p13), %s799_s26, 4294967040  ;;  %s31_s23 = sadd.s32 1, %s1544_s23   ;;  %s1937_s6 = sld [smem:[#allocation19_spill]] }
 0x210   : > { %p28_p12 = scmp.ge.s32.totalorder %s31_s23, 4   ;;  %s1938_s20 = sld [smem:[#allocation22_spill]] }
 0x211   : > { %s1939_s21 = sld [smem:[#allocation20_spill]]  ;;  %s1941_s18 = smov %s1528_s19 }
 0x212   : > { %s1940_s22 = sld [smem:[#allocation21_spill]]  ;;  %30 = sbr.rel (!%p28_p12) target bundleno = 14 (0xe), region = 149 }
 0x215   : > { %s1942_s19 = smov %s1937_s6 }
 0x217   :  { %804 = vsyncpa [#allocation3], 1 }
 0x218   :  { %806 = vsyncpa [#allocation3 + $0x1], 1 }
 0x219   :  { %807 = vsyncpa [#allocation6], 1 }
 0x21a   :  { %809 = vsyncpa [#allocation6 + $0x1], 1 }
 0x21b   :  { %810 = vsyncpa [#allocation9], 1 }
 0x21c   :  { %812 = vsyncpa [#allocation9 + $0x1], 1 }
 0x21d   :  { %813 = vsyncpa [#allocation4], 1 }
 0x21e   :  { %815 = vsyncpa [#allocation4 + $0x1], 1 }
 0x21f   :  { %816 = vsyncpa [#allocation12], 1 }
 0x220   :  { %818 = vsyncpa [#allocation12 + $0x1], 1 }

</bundles_post_ra>
